<compile_context>
chip_gen: v7x
topology: tpu7x:2x2x1
jax: 0.10.0
libtpu: 0.0.40
codegen_flags: <defaults>
</compile_context>

<pallas_src>
import functools
import math

import jax
import jax.numpy as jnp
from jax.experimental import pallas as pl
from jax.experimental.pallas import tpu as pltpu

_NEG_INF = -1e30


def _round_up(x, m):
    return ((x + m - 1) // m) * m


@functools.lru_cache(maxsize=None)
def _strided_roll_ok(rows, cols):
    """One-time capability/semantics probe at the exact (rows, cols) used.

    Checks that pltpu.roll(x, 0, axis=1, stride=1, stride_axis=0) lowers on this
    backend and produces y[i, t] = x[i, (t - i) % cols] (row i rolled right by i).
    If not, the kernel falls back to the log2(rows) power-of-two roll+select skew.
    """
    def probe(x_ref, o_ref):
        o_ref[...] = pltpu.roll(x_ref[...], 0, 1, stride=1, stride_axis=0)

    x = (jnp.arange(rows, dtype=jnp.float32)[:, None] * cols
         + jnp.arange(cols, dtype=jnp.float32)[None, :])
    want_idx = (jnp.arange(cols)[None, :] - jnp.arange(rows)[:, None]) % cols
    want = jnp.take_along_axis(x, want_idx, axis=1)
    try:
        got = pl.pallas_call(
            probe, out_shape=jax.ShapeDtypeStruct((rows, cols), jnp.float32))(x)
        return bool(jnp.array_equal(jax.block_until_ready(got), want))
    except Exception:
        return False


def _make_seq_attention_kernel(Tm, W, W_roll, L, hidden_size, use_strided_roll):
    inv_sqrt_h = 1.0 / math.sqrt(hidden_size)

    if use_strided_roll:
        def skew_rows(x):
            # y[i, t] = x[i, (t - i) mod W_roll] in a single XLU pass
            return pltpu.roll(x, 0, 1, stride=1, stride_axis=0)
    else:
        def skew_rows(x):
            # fallback: log2(Tm) static power-of-two rolls + per-row selects
            row = jax.lax.broadcasted_iota(jnp.int32, (Tm, W_roll), 0)
            y = x
            shift = 1
            while shift < Tm:
                y = jnp.where((row & shift) != 0, pltpu.roll(y, shift, 1), y)
                shift *= 2
            return y

    def kernel(q_ref, k_ref, v_ref, pe_ref, bias_ref, o_ref):
        m0 = pl.multiple_of(pl.program_id(1) * Tm, Tm)

        # fold 1/sqrt(H) into q: both matmuls below are linear in q, so this is
        # an H-wide multiply instead of a W-wide multiply on the scores.
        q = q_ref[0] * inv_sqrt_h             # (Tm, H)   native dtype
        k_win = k_ref[0, pl.ds(m0, W), :]     # (W, H)    keys   [m0, m0 + W)
        v_win = v_ref[0, pl.ds(m0, W), :]     # (W, H)    values [m0, m0 + W)
        pe = pe_ref[0]                        # (H, W_roll)  zero-padded past L

        # content scores over the whole window, on the MXU (f32 accumulate)
        s = jax.lax.dot_general(q, k_win, (((1,), (1,)), ((), ())),
                                preferred_element_type=jnp.float32)   # (Tm, W)

        # relative-position scores on the MXU, then skewed to window coords so
        # that locally pos_skew[i, i + j] = pos[i, j]; the roll wrap-around
        # lands in the zero padding because W_roll >= W.
        pos = jnp.dot(q, pe, preferred_element_type=jnp.float32)      # (Tm, W_roll)
        pos_skew = skew_rows(pos)[:, :W]                              # (Tm, W)

        # band bias is 0 in-band / -1e30 out-of-band (precomputed, VMEM-resident):
        # the masked full-width softmax equals the softmax over the L-wide band,
        # and the masked exp terms underflow to exactly 0 (every row has its
        # rel == 0 in-band entry, so the row max is finite) -> no selects needed.
        scores = s + pos_skew + bias_ref[...]
        m_max = jnp.max(scores, axis=-1, keepdims=True)
        e = jnp.exp(scores - m_max)
        denom = jnp.sum(e, axis=-1, keepdims=True)
        attn = e * pl.reciprocal(denom, approx=True)                  # (Tm, W)
        # TODO(synk): dropout (train-time stochastic mask) not applied; identity at inference.

        # skew(attn) @ value == attn_full @ v_window (masked entries are exactly 0)
        out = jnp.dot(attn.astype(v_win.dtype), v_win,
                      preferred_element_type=jnp.float32)             # (Tm, H)
        o_ref[0] = out.astype(o_ref.dtype)

    return kernel


def seq_attention(query, key, value, key_pe, hidden_size):
    B, M, H = query.shape
    K = key.shape[1]
    L = K - M                                  # attn_span
    assert key_pe.shape == (1, H, L)
    assert L >= 1, "attn_span must be >= 1"

    # M-tile: largest sublane/MXU friendly tile that divides M (capped at 128 --
    # raising Tm only inflates the (Tm, Tm+L) softmax width for no MXU gain).
    Tm = next((t for t in (128, 64, 32, 16, 8) if M % t == 0), M)
    # NOTE: if M has no 8-aligned divisor we fall back to a single Tm = M tile;
    # for very large such M the (Tm, W) working set could exceed VMEM.
    W = Tm + L                                 # key/value window per query tile
    W_roll = _round_up(max(W, 128), 128)       # lane-aligned roll width (>= W)

    use_strided = _strided_roll_ok(Tm, W_roll)
    kernel = _make_seq_attention_kernel(Tm, W, W_roll, L, hidden_size, use_strided)

    # zero-pad key_pe to W_roll lanes once in the wrapper so the in-kernel pos
    # matmul directly produces the roll-width buffer (no in-kernel concat).
    key_pe_pad = jnp.pad(key_pe, ((0, 0), (0, 0), (0, W_roll - L)))

    # precomputed additive band mask, DMA'd once and kept VMEM-resident
    rel = (jnp.arange(W, dtype=jnp.int32)[None, :]
           - jnp.arange(Tm, dtype=jnp.int32)[:, None])
    band_bias = jnp.where((rel >= 0) & (rel < L), 0.0, _NEG_INF).astype(jnp.float32)

    # generation-aware VMEM budget: only raise the scoped limit when the
    # double-buffered resident footprint needs it (v6e has headroom to ~100 MB;
    # cap below physical on v7x/v5e).
    itemsize = jnp.dtype(query.dtype).itemsize
    resident = (2 * itemsize * (2 * Tm * H + 2 * K * H)
                + 2 * 4 * (H * W_roll + Tm * W))
    params = {"dimension_semantics": ("parallel", "parallel")}
    if resident + (8 << 20) > (24 << 20):
        try:
            cap = int(pltpu.get_tpu_info().vmem_capacity_bytes * 0.9)
        except Exception:
            cap = 56 << 20
        params["vmem_limit_bytes"] = min(int(1.5 * resident) + (8 << 20), cap)
    # TODO(synk): for spans where resident K/V exceeds the per-core VMEM budget
    # (v7x 64 MiB / v5e), switch K/V to memory_space=pl.ANY + an inner
    # emit_pipeline over the (W, H) window (or bf16 residency) rather than
    # re-streaming full K/V per m tile.

    return pl.pallas_call(
        kernel,
        out_shape=jax.ShapeDtypeStruct((B, M, H), query.dtype),
        grid=(B, M // Tm),
        in_specs=[
            pl.BlockSpec((1, Tm, H), lambda b, m: (b, m, 0)),       # query tile
            # key/value stay resident per batch (index_map ignores m, so they are
            # only re-DMA'd when b changes); the kernel slices its (W, H) window
            # at a Tm-aligned start.  B is the leading parallel axis so each v7x
            # TensorCore keeps its own resident K/V.
            pl.BlockSpec((1, K, H), lambda b, m: (b, 0, 0)),        # key
            pl.BlockSpec((1, K, H), lambda b, m: (b, 0, 0)),        # value
            pl.BlockSpec((1, H, W_roll), lambda b, m: (0, 0, 0)),   # key_pe (padded, shared)
            pl.BlockSpec((Tm, W), lambda b, m: (0, 0)),             # band bias (shared)
        ],
        out_specs=pl.BlockSpec((1, Tm, H), lambda b, m: (b, m, 0)),
        # TODO(synk): with H < 128 the (Tm, H) output store uses masked lanes;
        # if stores ever show in profiles, pack 128//H heads per grid step for a
        # lane-dense store (not done here: the kernel is VPU/EUP-bound and the
        # store is a small fraction of a step).
        compiler_params=pltpu.CompilerParams(**params),
    )(query, key, value, key_pe_pad, band_bias)


def seq_attention_ref(query, key, value, key_pe, hidden_size):
    """Pure-JAX reference reproducing the torch _skew/_unskew semantics."""
    B, M, H = query.shape
    K = key.shape[1]
    L = K - M
    full = jnp.einsum("bmh,bkh->bmk", query, key)
    idx = jnp.arange(M)[:, None] + jnp.arange(L)[None, :]              # (M, L)
    band = jnp.take_along_axis(full, jnp.broadcast_to(idx, (B, M, L)), axis=-1)
    attn_pos = jnp.einsum("bmh,xhl->bml", query, key_pe)
    attn = (band + attn_pos) / math.sqrt(hidden_size)
    attn = jax.nn.softmax(attn, axis=-1)
    v_win = value[:, idx]                                              # (B, M, L, H)
    return jnp.einsum("bml,bmlh->bmh", attn, v_win)


if __name__ == "__main__":
    def run_case(B, M, attn_span, hidden, seed_key):
        K = M + attn_span
        kq, kk, kv, kp = jax.random.split(seed_key, 4)
        query = jax.random.normal(kq, (B, M, hidden), dtype=jnp.float32)
        key_ = jax.random.normal(kk, (B, K, hidden), dtype=jnp.float32)
        value = jax.random.normal(kv, (B, K, hidden), dtype=jnp.float32)
        key_pe = 0.02 * jax.random.normal(kp, (1, hidden, attn_span), dtype=jnp.float32)

        out = jax.block_until_ready(seq_attention(query, key_, value, key_pe, hidden))
        ref = seq_attention_ref(query, key_, value, key_pe, hidden)
        assert out.shape == (B, M, hidden)
        # approx reciprocal in the softmax normalization -> slightly relaxed tolerance
        err = float(jnp.max(jnp.abs(out - ref)))
        assert jnp.allclose(out, ref, atol=2e-2, rtol=2e-2), err

    root = jax.random.PRNGKey(0)
    k1, k2 = jax.random.split(root)
    run_case(B=2, M=8, attn_span=8, hidden=32, seed_key=k1)      # toy config
    run_case(B=2, M=256, attn_span=64, hidden=32, seed_key=k2)   # exercises M-tiling, grid=(2, 2)
    print("KERNEL_OK")
</pallas_src>

<mosaic_0001>
module attributes {stable_mosaic.version = 11 : i64} {
  func.func @probe(%arg0: memref<8x128xf32, #tpu.memory_space<vmem>>, %arg1: memref<8x128xf32, #tpu.memory_space<vmem>>) attributes {dimension_semantics = [], scalar_prefetch = 0 : i64, scratch_operands = 0 : i64, tpu.core_type = #tpu.core_type<tc>} {
    %c0 = arith.constant 0 : index
    %c0_0 = arith.constant 0 : index
    %0 = vector.load %arg0[%c0, %c0_0] : memref<8x128xf32, #tpu.memory_space<vmem>>, vector<8x128xf32>
    %c0_i32 = arith.constant 0 : i32
    %1 = tpu.dynamic_rotate %0 by %c0_i32 dim 1 {stride = 1 : si32, stride_dimension = 0 : si32} : vector<8x128xf32>, i32 -> vector<8x128xf32>
    %c0_1 = arith.constant 0 : index
    %c0_2 = arith.constant 0 : index
    %2 = vector.load %arg1[%c0_1, %c0_2] : memref<8x128xf32, #tpu.memory_space<vmem>>, vector<8x128xf32>
    tpu.vector_store %arg1[%c0_1, %c0_2], %1 {strides = array<i32>} : memref<8x128xf32, #tpu.memory_space<vmem>>, vector<8x128xf32>,
    return
  }
}

module attributes {stable_mosaic.version = 11 : i64} {
  func.func @kernel(%arg0: i32, %arg1: i32, %arg2: memref<1x8x32xf32, #tpu.memory_space<vmem>>, %arg3: memref<1x16x32xf32, #tpu.memory_space<vmem>>, %arg4: memref<1x16x32xf32, #tpu.memory_space<vmem>>, %arg5: memref<1x32x128xf32, #tpu.memory_space<vmem>>, %arg6: memref<8x16xf32, #tpu.memory_space<vmem>>, %arg7: memref<1x8x32xf32, #tpu.memory_space<vmem>>) attributes {dimension_semantics = [#tpu.dimension_semantics<parallel>, #tpu.dimension_semantics<parallel>], iteration_bounds = array<i64: 2, 1>, scalar_prefetch = 0 : i64, scratch_operands = 0 : i64, tpu.core_type = #tpu.core_type<tc>, window_params = [{transform_indices = @transform_0, window_bounds = array<i64: 1, 8, 32>}, {transform_indices = @transform_1, window_bounds = array<i64: 1, 16, 32>}, {transform_indices = @transform_2, window_bounds = array<i64: 1, 16, 32>}, {pipeline_mode = #tpu.pipeline_mode<synchronous>, transform_indices = @transform_3, window_bounds = array<i64: 1, 32, 128>}, {pipeline_mode = #tpu.pipeline_mode<synchronous>, transform_indices = @transform_4, window_bounds = array<i64: 8, 16>}, {transform_indices = @transform_5, window_bounds = array<i64: 1, 8, 32>}]} {
    %c8_i32 = arith.constant 8 : i32
    %0 = arith.muli %arg1, %c8_i32 : i32
    %1 = tpu.assume_multiple %0, 8 : i32
    %c0 = arith.constant 0 : index
    %c0_0 = arith.constant 0 : index
    %c0_1 = arith.constant 0 : index
    %2 = vector.load %arg2[%c0, %c0_0, %c0_1] : memref<1x8x32xf32, #tpu.memory_space<vmem>>, vector<1x8x32xf32>
    %3 = vector.shape_cast %2 : vector<1x8x32xf32> to vector<8x32xf32>
    %cst = arith.constant 0.176776692 : f32
    %4 = vector.broadcast %cst : f32 to vector<8x32xf32>
    %5 = arith.mulf %3, %4 : vector<8x32xf32>
    %c0_2 = arith.constant 0 : index
    %6 = arith.index_cast %1 : i32 to index
    %c0_3 = arith.constant 0 : index
    %7 = vector.load %arg3[%c0_2, %6, %c0_3] : memref<1x16x32xf32, #tpu.memory_space<vmem>>, vector<1x16x32xf32>
    %8 = vector.shape_cast %7 : vector<1x16x32xf32> to vector<16x32xf32>
    %c0_4 = arith.constant 0 : index
    %9 = arith.index_cast %1 : i32 to index
    %c0_5 = arith.constant 0 : index
    %10 = vector.load %arg4[%c0_4, %9, %c0_5] : memref<1x16x32xf32, #tpu.memory_space<vmem>>, vector<1x16x32xf32>
    %11 = vector.shape_cast %10 : vector<1x16x32xf32> to vector<16x32xf32>
    %c0_6 = arith.constant 0 : index
    %c0_7 = arith.constant 0 : index
    %c0_8 = arith.constant 0 : index
    %12 = vector.load %arg5[%c0_6, %c0_7, %c0_8] : memref<1x32x128xf32, #tpu.memory_space<vmem>>, vector<1x32x128xf32>
    %13 = vector.shape_cast %12 : vector<1x32x128xf32> to vector<32x128xf32>
    %cst_9 = arith.constant dense<0.000000e+00> : vector<8x16xf32>
    %14 = tpu.matmul %5, %8, %cst_9 {dimension_numbers = #tpu.dot_dimension_numbers<[1], [1], [0], [0], [0, 0, 1, 0], [], []>} : vector<8x32xf32>, vector<16x32xf32>, vector<8x16xf32> -> vector<8x16xf32>
    %cst_10 = arith.constant dense<0.000000e+00> : vector<8x128xf32>
    %15 = tpu.matmul %5, %13, %cst_10 {dimension_numbers = #tpu.dot_dimension_numbers<[1], [0], [0], [1], [0, 0, 1, 1], [], []>} : vector<8x32xf32>, vector<32x128xf32>, vector<8x128xf32> -> vector<8x128xf32>
    %16 = tpu.iota {dimensions = array<i32: 0>} : vector<8x128xi32>
    %c1_i32 = arith.constant 1 : i32
    %17 = vector.broadcast %c1_i32 : i32 to vector<8x128xi32>
    %18 = arith.andi %16, %17 : vector<8x128xi32>
    %c0_i32 = arith.constant 0 : i32
    %19 = vector.broadcast %c0_i32 : i32 to vector<8x128xi32>
    %20 = arith.cmpi ne, %18, %19 : vector<8x128xi32>
    %c1_i32_11 = arith.constant 1 : i32
    %21 = tpu.dynamic_rotate %15 by %c1_i32_11 dim 1 : vector<8x128xf32>, i32 -> vector<8x128xf32>
    %22 = arith.select %20, %21, %15 : vector<8x128xi1>, vector<8x128xf32>
    %c2_i32 = arith.constant 2 : i32
    %23 = vector.broadcast %c2_i32 : i32 to vector<8x128xi32>
    %24 = arith.andi %16, %23 : vector<8x128xi32>
    %c0_i32_12 = arith.constant 0 : i32
    %25 = vector.broadcast %c0_i32_12 : i32 to vector<8x128xi32>
    %26 = arith.cmpi ne, %24, %25 : vector<8x128xi32>
    %c2_i32_13 = arith.constant 2 : i32
    %27 = tpu.dynamic_rotate %22 by %c2_i32_13 dim 1 : vector<8x128xf32>, i32 -> vector<8x128xf32>
    %28 = arith.select %26, %27, %22 : vector<8x128xi1>, vector<8x128xf32>
    %c4_i32 = arith.constant 4 : i32
    %29 = vector.broadcast %c4_i32 : i32 to vector<8x128xi32>
    %30 = arith.andi %16, %29 : vector<8x128xi32>
    %c0_i32_14 = arith.constant 0 : i32
    %31 = vector.broadcast %c0_i32_14 : i32 to vector<8x128xi32>
    %32 = arith.cmpi ne, %30, %31 : vector<8x128xi32>
    %c4_i32_15 = arith.constant 4 : i32
    %33 = tpu.dynamic_rotate %28 by %c4_i32_15 dim 1 : vector<8x128xf32>, i32 -> vector<8x128xf32>
    %34 = arith.select %32, %33, %28 : vector<8x128xi1>, vector<8x128xf32>
    %35 = vector.extract_strided_slice %34 {offsets = [0, 0], sizes = [8, 16], strides = [1, 1]} : vector<8x128xf32> to vector<8x16xf32>
    %36 = arith.addf %14, %35 : vector<8x16xf32>
    %c0_16 = arith.constant 0 : index
    %c0_17 = arith.constant 0 : index
    %37 = vector.load %arg6[%c0_16, %c0_17] : memref<8x16xf32, #tpu.memory_space<vmem>>, vector<8x16xf32>
    %38 = arith.addf %36, %37 : vector<8x16xf32>
    %cst_18 = arith.constant dense<0xFF800000> : vector<8xf32>
    %39 = vector.multi_reduction <maximumf>, %38, %cst_18 [1] : vector<8x16xf32> to vector<8xf32>
    %40 = vector.shape_cast %39 : vector<8xf32> to vector<8x1xf32>
    %41 = vector.broadcast %40 : vector<8x1xf32> to vector<8x16xf32>
    %42 = arith.subf %38, %41 : vector<8x16xf32>
    %43 = math.exp %42 : vector<8x16xf32>
    %cst_19 = arith.constant dense<0.000000e+00> : vector<8xf32>
    %44 = vector.multi_reduction <add>, %43, %cst_19 [1] : vector<8x16xf32> to vector<8xf32>
    %45 = vector.shape_cast %44 : vector<8xf32> to vector<8x1xf32>
    %46 = tpu.reciprocal %45 {approx = true} : vector<8x1xf32> -> vector<8x1xf32>
    %47 = vector.broadcast %46 : vector<8x1xf32> to vector<8x16xf32>
    %48 = arith.mulf %43, %47 : vector<8x16xf32>
    %cst_20 = arith.constant dense<0.000000e+00> : vector<8x32xf32>
    %49 = tpu.matmul %48, %11, %cst_20 {dimension_numbers = #tpu.dot_dimension_numbers<[1], [0], [0], [1], [0, 0, 1, 1], [], []>} : vector<8x16xf32>, vector<16x32xf32>, vector<8x32xf32> -> vector<8x32xf32>
    %c0_21 = arith.constant 0 : index
    %c0_22 = arith.constant 0 : index
    %c0_23 = arith.constant 0 : index
    %50 = vector.load %arg7[%c0_21, %c0_22, %c0_23] : memref<1x8x32xf32, #tpu.memory_space<vmem>>, vector<1x8x32xf32>
    %51 = vector.shape_cast %50 : vector<1x8x32xf32> to vector<8x32xf32>
    %52 = vector.shape_cast %49 : vector<8x32xf32> to vector<1x8x32xf32>
    tpu.vector_store %arg7[%c0_21, %c0_22, %c0_23], %52 {strides = array<i32>} : memref<1x8x32xf32, #tpu.memory_space<vmem>>, vector<1x8x32xf32>,
    return
  }
  func.func @transform_0(%arg0: i32, %arg1: i32) -> (i32, i32, i32) {
    %c0_i32 = arith.constant 0 : i32
    %c0_i32_0 = arith.constant 0 : i32
    return %arg0, %arg1, %c0_i32 : i32, i32, i32
  }
  func.func @transform_1(%arg0: i32, %arg1: i32) -> (i32, i32, i32) {
    %c0_i32 = arith.constant 0 : i32
    %c0_i32_0 = arith.constant 0 : i32
    %c0_i32_1 = arith.constant 0 : i32
    return %arg0, %c0_i32, %c0_i32_0 : i32, i32, i32
  }
  func.func @transform_2(%arg0: i32, %arg1: i32) -> (i32, i32, i32) {
    %c0_i32 = arith.constant 0 : i32
    %c0_i32_0 = arith.constant 0 : i32
    %c0_i32_1 = arith.constant 0 : i32
    return %arg0, %c0_i32, %c0_i32_0 : i32, i32, i32
  }
  func.func @transform_3(%arg0: i32, %arg1: i32) -> (i32, i32, i32) {
    %c0_i32 = arith.constant 0 : i32
    %c0_i32_0 = arith.constant 0 : i32
    %c0_i32_1 = arith.constant 0 : i32
    %c0_i32_2 = arith.constant 0 : i32
    return %c0_i32, %c0_i32_0, %c0_i32_1 : i32, i32, i32
  }
  func.func @transform_4(%arg0: i32, %arg1: i32) -> (i32, i32) {
    %c0_i32 = arith.constant 0 : i32
    %c0_i32_0 = arith.constant 0 : i32
    %c0_i32_1 = arith.constant 0 : i32
    return %c0_i32, %c0_i32_0 : i32, i32
  }
  func.func @transform_5(%arg0: i32, %arg1: i32) -> (i32, i32, i32) {
    %c0_i32 = arith.constant 0 : i32
    %c0_i32_0 = arith.constant 0 : i32
    return %arg0, %arg1, %c0_i32 : i32, i32, i32
  }
}

</mosaic_0001>

<bundles_post_ra>
// kernel: tpu_custom_call.1
= control target key start
LH: loop header
LB: loop body
LE: loop exit
PB: predicated region body
PF: predicated region fallthrough
CT: control target
= control target key end

     0   :  { %6 = vsyncpa [#allocation3], 0  ;;  %s129_s0 = inlined_call_operand.hbm [shape: f32[8,128], index: 0, kind: input, shape index: {}]   ;;  %s130_s1 = inlined_call_operand.hbm [shape: f32[8,128], index: 1, kind: output, shape index: {}]  }
   0x1   :  { %7 = vsyncpa [#allocation4], 0  ;;  %s92_s6 = smov [#allocation2]   ;;  %s44_s10 = scalar_lea.hbm %s129_s0, 128 }
   0x2   :  { %s14_s7 = sshll.u32 %s92_s6, 4  ;;  %p45_p0 = scmp.ne.s32.totalorder %s129_s0, %s44_s10  ;;  %s15_s7 = int_to_ptr.vmem [resolvable:$true] %s14_s7 }
   0x3   :  { %p48_p1 = scmp.lt.u32.totalorder %s44_s10, %s129_s0 }
   0x5   :  { %p50_p2 = pnand %p48_p1, %p45_p0 }
   0x7   :  { %53 = shalt.err (!%p50_p2)
}
   0x8   :  { %s54_s15 = scalar_lea.vmem %s15_s7, 128  ;;  %p59_p4 = scmp.lt.s32.totalorder %s15_s7, %s15_s7 }
   0x9   :  { %p55_p3 = scmp.ne.s32.totalorder %s15_s7, %s54_s15  ;;  %p60_p5 = scmp.lt.s32.totalorder %s54_s15, %s54_s15 }
   0xb   :  { %p61_p6 = por %p60_p5, %p59_p4 }
   0xd   :  { %p62_p7 = pnand %p61_p6, %p55_p3 }
   0xf   :  { %65 = shalt.err (!%p62_p7)
}
  0x10   :  { %17 = dma.hbm_to_vmem [thread:$0]  %s129_s0, 128, %s15_s7, [#allocation3]  }
  0x11   :  { %88 = dma.done.wait [#allocation3], 128  }
  0x12   :  { %89 = vsyncadd [#allocation3], 4294967168  ;;  %v21_v0 = vld [vmem:[#allocation2] sm:$0xff]  ;;  %s93_s18 = smov 256   ;;  %s94_s19 = smov [#allocation5]  }
  0x13   :  { %23 = vrot.lane.b32.xlu0 %v21_v0, %s93_s18  ;;  %s32_s20 = sshll.u32 %s94_s19, 4  ;;  %s33_s20 = int_to_ptr.vmem [resolvable:$true] %s32_s20 }
  0x14   :  { %s66_s21 = scalar_lea.vmem %s33_s20, 128  ;;  %p71_p9 = scmp.lt.s32.totalorder %s33_s20, %s33_s20 }
  0x15   :  { %p67_p8 = scmp.ne.s32.totalorder %s33_s20, %s66_s21  ;;  %p72_p10 = scmp.lt.s32.totalorder %s66_s21, %s66_s21 }
  0x17   :  { %p73_p11 = por %p72_p10, %p71_p9 }
  0x19   :  { %p74_p12 = pnand %p73_p11, %p67_p8 }
  0x85   :  { %v24_v1 = vpop.permute.xlu0 %23 }
  0x86   :  { %25 = vst [vmem:[#allocation5] sm:$0xff] %v24_v1 }
  0x87   :  { %77 = shalt.err (!%p74_p12)
}
  0x88   :  { %s78_s0 = scalar_lea.hbm %s130_s1, 128 }
  0x89   :  { %p79_p13 = scmp.ne.s32.totalorder %s130_s1, %s78_s0  ;;  %p82_p0 = scmp.lt.u32.totalorder %s78_s0, %s130_s1 }
  0x8b   :  { %p84_p1 = pnand %p82_p0, %p79_p13 }
  0x8d   :  { %87 = shalt.err (!%p84_p1)
}
  0x8e   :  { %35 = dma.vmem_to_hbm [thread:$0]  %s33_s20, 128, %s130_s1, [#allocation4]  }
  0x8f   :  { %90 = dma.done.wait [#allocation4], 128  }
  0x90   :  { %91 = vsyncadd [#allocation4], 4294967168 }
  0x91   :  { %39 = vsyncpa [#allocation3], 1 }
  0x92   :  { %40 = vsyncpa [#allocation4], 1 }

// kernel: tpu_custom_call.1
= control target key start
LH: loop header
LB: loop body
LE: loop exit
PB: predicated region body
PF: predicated region fallthrough
CT: control target
= control target key end

     0   :  { %s1525_s0 = inlined_call_operand.hbm [shape: f32[2,8,32], index: 0, kind: input, shape index: {}]   ;;  %s1526_s1 = inlined_call_operand.hbm [shape: f32[2,16,32], index: 1, kind: input, shape index: {}]   ;;  %s1527_s2 = inlined_call_operand.hbm [shape: f32[2,16,32], index: 2, kind: input, shape index: {}]   ;;  %s1528_s3 = inlined_call_operand.hbm [shape: f32[1,32,128], index: 3, kind: input, shape index: {}]   ;;  %s1529_s4 = inlined_call_operand.vmem [shape: f32[8,16], index: 4, kind: input, shape index: {}]   ;;  %s1530_s5 = inlined_call_operand.hbm [shape: f32[2,8,32], index: 5, kind: output, shape index: {}]  }
   0x1   :  { %1551 = sst [smem:[#allocation22_spill]] %s1526_s1 }
   0x2   :  { %10 = vsyncpa [#allocation3], 0 }
   0x3   :  { %12 = vsyncpa [#allocation3 + $0x1], 0 }
   0x4   :  { %13 = vsyncpa [#allocation6], 0 }
   0x5   :  { %15 = vsyncpa [#allocation6 + $0x1], 0 }
   0x6   :  { %16 = vsyncpa [#allocation9], 0 }
   0x7   :  { %17 = vsyncpa [#allocation4], 0 }
   0x8   :  { %19 = vsyncpa [#allocation4 + $0x1], 0  ;;  %s1196_s18 = smov 0   ;;  %s1198_s19 = smov 0  }
   0x9   :  { %s1200_s20 = smov 0   ;;  %s1202_s21 = smov 0  }
   0xa   :  { %s1204_s22 = smov 0   ;;  %s1206_s23 = smov 0  }
   0xb LB: > { %1552 = sst [smem:[#allocation15_spill]] %s1131_s18  ;;  %s37_s24 = sadd.s32 1, %s1147_s22  ;;  %s1151_s23 = sphi %s1206_s23, %s25_s23   ;;  %s1147_s22 = sphi %s1204_s22, %s1585_s22   ;;  %s1143_s21 = sphi %s1202_s21, %s1584_s21   ;;  %s1139_s20 = sphi %s1200_s20, %s1583_s20   ;;  %s1135_s19 = sphi %s1198_s19, %s1587_s19   ;;  %s1131_s18 = sphi %s1196_s18, %s1586_s18  }
   0xc   : > { %1553 = sst [smem:[#allocation16_spill]] %s1139_s20  ;;  %s46_s25 = sadd.s32 1, %s1139_s20 }
   0xd   : > { %1554 = sst [smem:[#allocation17_spill]] %s1147_s22  ;;  %p39_p0 = scmp.ge.s32.totalorder %s37_s24, 2 }
   0xe   : > { %1555 = sst [smem:[#allocation18_spill]] %s1151_s23  ;;  %p1531_p1 = scmp.ne.s32.totalorder %s1139_s20, %s1135_s19 }
   0xf   : > { %p54_p2 = scmp.eq.s32.totalorder %s1151_s23, 0  ;;  %s1589_s24 = smov (%p39_p0, %s37_s24), 0 }
  0x10   : > { %1556 = sst [smem:[#allocation19_spill]] %s1589_s24  ;;  %s41_s26 = ssub.s32 %s1147_s22, %s1589_s24 }
  0x11   : > { %p55_p3 = por %p54_p2, %p1531_p1  ;;  %p44_p5 = scmp.eq.s32.totalorder %s41_s26, 0 }
  0x12   : > { %p879_p6 = scmp.lt.s32.totalorder %s1151_s23, 2  ;;  %s1241_s27 = sand.u32 1, %s1139_s20  }
  0x13   : > { %s240_s28 = sand.u32 1, %s1151_s23   ;;  %s776_s6 = sshll.u32 %s1241_s27, 4 }
  0x14   : > { %s1245_s29 = scalar_select %p44_p5, %s1139_s20, %s46_s25  }
  0x15   : > { %p1247_p7 = pnand %p879_p6, %p55_p3  ;;  %s797_s7 = sshll.u32 %s1147_s22, 8 }
  0x16   : > { %1557 = sst [smem:[#allocation20_spill]] %s1245_s29  ;;  %s1559_s1 = sld [smem:[#allocation22_spill]] }
  0x17   : > { %s1558_s30 = scalar_select %p1247_p7, 1, 0 }
  0x18   : > { %s244_s11 = scalar_lea.vmem [#allocation5], %s776_s6  ;;  %s1264_s13 = scalar_lea.sflag [#allocation6], %s240_s28 }
  0x19   : > { %s251_s12 = sshll.u32 %s244_s11, 4  ;;  %p1270_p9 = pneg %p1247_p7  ;;  %s1262_s12 = int_to_ptr.vmem [resolvable:$true] %s251_s12 }
  0x1b   : > { %s1560_s15 = scalar_select %p1270_p9, 1, 0 }
  0x1c   : > { %s1258_s10 = scalar_lea.hbm %s1559_s1, %s797_s7  ;;  %s948_s25 = scalar_lea.hbm %s1559_s1, 512 }
  0x1d   : > { %s943_s14 = scalar_lea.hbm %s1258_s10, 256  ;;  %p949_p12 = scmp.lt.u32.totalorder %s1258_s10, %s1559_s1 }
  0x1e   : > { %p944_p8 = scmp.ne.s32.totalorder %s1258_s10, %s943_s14  ;;  %p950_p13 = scmp.lt.u32.totalorder %s948_s25, %s943_s14 }
  0x1f   : > { %p952_p2 = scmp.lt.u32.totalorder %s943_s14, %s1258_s10 }
  0x20   : > { %p946_p10 = pnand %p1270_p9, %p944_p8  ;;  %p951_p0 = por %p950_p13, %p949_p12 }
  0x22   : > { %p947_p11 = pneg %p946_p10  ;;  %p953_p3 = por %p952_p2, %p951_p0 }
  0x24   : > { %p954_p5 = pnand %p953_p3, %p947_p11 }
  0x26   : > { %957 = shalt.err (!%p954_p5)
}
  0x27   : > { %s958_s28 = scalar_lea.vmem %s1262_s12, 256  ;;  %s1153_s9 = smov [#allocation5]  }
  0x28   : > { %p959_p6 = scmp.ne.s32.totalorder %s1262_s12, %s958_s28  ;;  %s963_s11 = sshll.u32 %s1153_s9, 4  ;;  %s964_s11 = int_to_ptr.vmem [resolvable:$false] %s963_s11 }
  0x29   : > { %s965_s16 = scalar_lea.vmem %s964_s11, 512  ;;  %p966_p4 = scmp.lt.s32.totalorder %s1262_s12, %s964_s11 }
  0x2a   : > { %p961_p8 = pnand %p959_p6, %p1270_p9  ;;  %p967_p1 = scmp.lt.s32.totalorder %s965_s16, %s958_s28 }
  0x2c   : > { %p962_p10 = pneg %p961_p8  ;;  %p968_p12 = por %p967_p1, %p966_p4 }
  0x2e   : > { %p969_p13 = pnand %p968_p12, %p962_p10 }
  0x30   : > { %972 = shalt.err (!%p969_p13)
}
  0x31   : > { %s1532_s14 = smov 128   ;;  %s1534_s17 = smov 8  }
  0x32   : > { %870 = dma.hbm_to_vmem [thread:$0]  (!%p1247_p7), %s1258_s10, 256, %s1262_s12, %s1264_s13, %s1532_s14, %s1532_s14, %s1534_s17  }
  0x33   : > { %s1302_s8 = scalar_lea.hbm %s1527_s2, %s797_s7  ;;  %s265_s28 = scalar_lea.vmem [#allocation7], %s776_s6 }
  0x34   : > { %s272_s9 = sshll.u32 %s265_s28, 4  ;;  %s1307_s11 = sadd.s32 4294967295, %s1151_s23   ;;  %s1337_s9 = int_to_ptr.vmem [resolvable:$true] %s272_s9 }
  0x35   : > { %s770_s16 = sadd.s32 4294967294, %s1151_s23   ;;  %p59_p1 = scmp.ne.s32.totalorder %s1135_s19, %s1131_s18 }
  0x36   : > { %p1543_p4 = scmp.eq.s32.totalorder %s1307_s11, 0  ;;  %p179_p11 = scmp.eq.s32.totalorder %s1307_s11, 1 }
  0x37   : > { %p185_p0 = scmp.eq.s32.totalorder %s770_s16, 1  ;;  %p771_p2 = scmp.ge.s32.totalorder %s1151_s23, 1 }
  0x38   : > { %p1317_p3 = por %p1543_p4, %p59_p1  ;;  %p1562_p5 = scmp.ne.s32.totalorder %s1139_s20, %s1135_s19 }
  0x39   : > { %p1328_p8 = por %p185_p0, %p59_p1  ;;  %p192_p10 = scmp.lt.s32.totalorder %s1151_s23, 3 }
  0x3a   : > { %s1561_s7 = scalar_select %p1317_p3, 1, 0 }
  0x3b   : > { %p1324_p6 = por %p179_p11, %p1562_p5  ;;  %p1333_p12 = pnand %p771_p2, %p192_p10 }
  0x3c   : > { %s1564_s10 = scalar_select %p1328_p8, 1, 0 }
  0x3d   : > { %s1563_s6 = scalar_select %p1324_p6, 1, 0 }
  0x3e   : > { %1565 = sst [smem:[#allocation21_spill]] %s1564_s10  ;;  %s1156_s25 = smov [#allocation8]  }
  0x3f   : > { %s1566_s12 = scalar_select %p1333_p12, 1, 0 }
  0x40   : > { %s204_s26 = sshll.u32 %s1156_s25, 4  ;;  %p860_p13 = pneg %p1333_p12  ;;  %s1339_s26 = int_to_ptr.vmem [resolvable:$true] %s204_s26 }
  0x41   : > { %s774_s28 = sshll.u32 %s1241_s27, 3  ;;  %s775_s16 = sshll.u32 %s1147_s22, 7 }
  0x42   : > { %p1347_p1 = pnand %p860_p13, %p1543_p4  ;;  %s1354_s24 = scalar_lea.hbm %s1525_s0, %s775_s16 }
  0x43   : > { %s225_s25 = scalar_lea.vmem [#allocation2], %s774_s28  ;;  %s973_s10 = scalar_lea.hbm %s1528_s3, 512 }
  0x44   : > { %s233_s29 = sshll.u32 %s225_s25, 4  ;;  %p974_p11 = scmp.ne.s32.totalorder %s1528_s3, %s973_s10  ;;  %s1356_s29 = int_to_ptr.vmem [resolvable:$true] %s233_s29 }
  0x45   : > { %p975_p0 = pneg %p1347_p1  ;;  %p980_p10 = scmp.lt.u32.totalorder %s973_s10, %s1528_s3 }
  0x47   : > { %p976_p2 = pnand %p975_p0, %p974_p11 }
  0x49   : > { %p977_p5 = pneg %p976_p2 }
  0x4b   : > { %p982_p13 = pnand %p980_p10, %p977_p5 }
  0x4d   : > { %985 = shalt.err (!%p982_p13)
}
  0x4e   : > { %s986_s28 = scalar_lea.vmem %s1339_s26, 512  ;;  %p994_p3 = scmp.lt.s32.totalorder %s1339_s26, %s1339_s26 }
  0x4f   : > { %p987_p4 = scmp.ne.s32.totalorder %s1339_s26, %s986_s28  ;;  %p995_p12 = scmp.lt.s32.totalorder %s986_s28, %s986_s28 }
  0x51   : > { %p989_p8 = pnand %p987_p4, %p975_p0  ;;  %p996_p7 = por %p995_p12, %p994_p3 }
  0x53   : > { %p990_p6 = pneg %p989_p8 }
  0x55   : > { %p997_p9 = pnand %p996_p7, %p990_p6 }
  0x57   : > { %1000 = shalt.err (!%p997_p9)
}
  0x58   : > { %s1568_s18 = smov 8   ;;  %s1569_s20 = smov 128  }
  0x59   : > { %863 = dma.hbm_to_vmem [thread:$0]  (!%p1347_p1), %s1528_s3, 512, %s1339_s26, [#allocation9], %s1569_s20, %s1569_s20, %s1568_s18  }
  0x5a   : > { %s222_s10 = scalar_lea.sflag [#allocation3], %s1241_s27  ;;  %s1001_s16 = scalar_lea.hbm %s1354_s24, 128 }
  0x5b   : > { %p1002_p7 = scmp.ne.s32.totalorder %s1354_s24, %s1001_s16  ;;  %p1570_p9 = scmp.ne.s32.totalorder %s1560_s15, 0 }
  0x5c   : > { %s1006_s1 = scalar_lea.hbm %s1525_s0, 256  ;;  %p1007_p6 = scmp.lt.u32.totalorder %s1354_s24, %s1525_s0 }
  0x5d   : > { %p1004_p4 = pnand %p1002_p7, %p1570_p9  ;;  %p1008_p8 = scmp.lt.u32.totalorder %s1006_s1, %s1001_s16 }
  0x5e   : > { %p1010_p11 = scmp.lt.u32.totalorder %s1001_s16, %s1354_s24 }
  0x5f   : > { %p1005_p3 = pneg %p1004_p4  ;;  %p1009_p12 = por %p1008_p8, %p1007_p6 }
  0x61   : > { %p1011_p0 = por %p1010_p11, %p1009_p12 }
  0x63   : > { %p1012_p2 = pnand %p1011_p0, %p1005_p3 }
  0x65   : > { %1015 = shalt.err (!%p1012_p2)
}
  0x66   : > { %s1016_s27 = scalar_lea.vmem %s1356_s29, 128  ;;  %s1157_s26 = smov [#allocation2]  }
  0x67   : > { %p1017_p1 = scmp.ne.s32.totalorder %s1356_s29, %s1016_s27  ;;  %s1021_s22 = sshll.u32 %s1157_s26, 4  ;;  %s1022_s22 = int_to_ptr.vmem [resolvable:$false] %s1021_s22 }
  0x68   : > { %s1023_s23 = scalar_lea.vmem %s1022_s22, 256  ;;  %p1024_p13 = scmp.lt.s32.totalorder %s1356_s29, %s1022_s22 }
  0x69   : > { %p1019_p5 = pnand %p1017_p1, %p1570_p9  ;;  %p1025_p7 = scmp.lt.s32.totalorder %s1023_s23, %s1016_s27 }
  0x6b   : > { %p1020_p10 = pneg %p1019_p5  ;;  %p1026_p4 = por %p1025_p7, %p1024_p13 }
  0x6d   : > { %p1027_p6 = pnand %p1026_p4, %p1020_p10 }
  0x6f   : > { %1030 = shalt.err (!%p1027_p6)
}
  0x70   : > { %p1571_p3 = scmp.ne.s32.totalorder %s1558_s30, 0  ;;  %s1031_s16 = scalar_lea.hbm %s1302_s8, 256 }
  0x71   : > { %p1032_p8 = scmp.ne.s32.totalorder %s1302_s8, %s1031_s16  ;;  %s1036_s1 = scalar_lea.hbm %s1527_s2, 512 }
  0x72   : > { %867 = dma.hbm_to_vmem [thread:$0]  (!%p1571_p3), %s1354_s24, 128, %s1356_s29, %s222_s10  }
  0x73   : > { %p1034_p12 = pnand %p1032_p8, %p1570_p9  ;;  %p1037_p0 = scmp.lt.u32.totalorder %s1302_s8, %s1527_s2 }
  0x74   : > { %p1038_p2 = scmp.lt.u32.totalorder %s1036_s1, %s1031_s16  ;;  %p1040_p5 = scmp.lt.u32.totalorder %s1031_s16, %s1302_s8 }
  0x75   : > { %p1035_p11 = pneg %p1034_p12 }
  0x76   : > { %p1039_p1 = por %p1038_p2, %p1037_p0 }
  0x78   : > { %p1041_p10 = por %p1040_p5, %p1039_p1 }
  0x7a   : > { %p1042_p13 = pnand %p1041_p10, %p1035_p11 }
  0x7c   : > { %1045 = shalt.err (!%p1042_p13)
}
  0x7d   : > { %s1046_s24 = scalar_lea.vmem %s1337_s9, 256  ;;  %s1158_s29 = smov [#allocation7]  }
  0x7e   : > { %p1047_p7 = scmp.ne.s32.totalorder %s1337_s9, %s1046_s24  ;;  %s1051_s10 = sshll.u32 %s1158_s29, 4  ;;  %s1052_s10 = int_to_ptr.vmem [resolvable:$false] %s1051_s10 }
  0x7f   : > { %s1053_s27 = scalar_lea.vmem %s1052_s10, 512  ;;  %p1054_p8 = scmp.lt.s32.totalorder %s1337_s9, %s1052_s10 }
  0x80   : > { %p1049_p4 = pnand %p1047_p7, %p1570_p9  ;;  %p1055_p12 = scmp.lt.s32.totalorder %s1053_s27, %s1046_s24 }
  0x82   : > { %p1050_p6 = pneg %p1049_p4  ;;  %p1056_p0 = por %p1055_p12, %p1054_p8 }
  0x84   : > { %p1057_p2 = pnand %p1056_p0, %p1050_p6 }
  0x86   : > { %1060 = shalt.err (!%p1057_p2)
}
  0x87   : > { %873 = dma.hbm_to_vmem [thread:$0]  (!%p1571_p3), %s1302_s8, 256, %s1337_s9, %s1264_s13, %s1569_s20, %s1569_s20, %s1568_s18  }
  0x88   : > { %p1572_p9 = scmp.ne.s32.totalorder %s1566_s12, 0 }
  0x89   : > { %s1432_s15 = sand.u32 (!%p1572_p9), 1, %s1135_s19   ;;  %p1573_p11 = scmp.ne.s32.totalorder (!%p1572_p9), %s1561_s7, 0 }
  0x8a   : > { %284 = sbr.rel (%p1572_p9) target bundleno = 1266 (0x4f2), region = 40  ;;  %s783_s26 = sshll.u32 (!%p1572_p9), %s1432_s15, 3 }
  0x8b   : > { %s287_s22 = scalar_lea.sflag (!%p1572_p9), [#allocation3], %s1432_s15  ;;  %s290_s30 = scalar_lea.vmem (!%p1572_p9), [#allocation2], %s783_s26 }
  0x91   : > { %1114 = dma.done.wait (%p1573_p11), %s287_s22, 128  }
  0x92   : > { %1116 = vsyncadd (%p1573_p11), %s287_s22, 4294967168  ;;  %s295_s13 = sand.u32 1, %s1307_s11   ;;  %s784_s8 = sshll.u32 %s1432_s15, 4 }
  0x93   : > { %s296_s9 = scalar_lea.sflag [#allocation6], %s295_s13  ;;  %s299_s12 = scalar_lea.vmem [#allocation5], %s784_s8 }
  0x94   : > { %1118 = dma.done.wait (%p1573_p11), %s296_s9, 512  }
  0x95   : > { %1120 = vsyncadd (%p1573_p11), %s296_s9, 4294966784  ;;  %s1448_s18 = scalar_lea.vmem [#allocation7], %s784_s8  ;;  %p1574_p3 = scmp.eq.s32.totalorder %s1307_s11, 0 }
  0x97   : > { %1122 = dma.done.wait (%p1574_p3), [#allocation9], 512   ;;  %p1575_p1 = pmov %p1574_p3 }
  0x98   : > { %v1159_v0 = vmov 0.0|0.0   ;;  %vm1160_vm0 = vmmov 0   ;;  %v1161_v1 = vmov 0.0   ;;  %v358_v2 = vld [vmem:[#allocation8] sm:$0xff]  ;;  %v359_v3 = vld [vmem:[#allocation8 + $0x8] sm:$0xff]  ;;  %v360_v4 = vld [vmem:[#allocation8 + $0x10] sm:$0xff]  ;;  %v436_v15 = vlaneseq }
  0x99   : > { %1124 = vsyncadd (%p1575_p1), [#allocation9], 4294966784  ;;  %835 = vmatprep.subr.bf16.mxu0 %v1159_v0  ;;  %818 = vmatprep.mubr.msk.f32.mxu0 %vm1160_vm0, %v1161_v1  ;;  %v836_v5 = vpack.c.bf16 %v359_v3, %v358_v2  ;;  %v361_v6 = vld [vmem:[#allocation8 + $0x18] sm:$0xff]  ;;  %vm362_vm1 = vcmask 261120   ;;  %v353_v10 = vld [vmem:[%s299_s12] sm:$0xff]  ;;  %s1162_s11 = smov 1  }
  0x9a   : > { %841 = vmatprep.subr.bf16.mxu1 %v1159_v0  ;;  %825 = vmatprep.mubr.msk.f32.mxu1 %vm1160_vm0, %v1161_v1  ;;  %v839_v7 = vpack.c.bf16 %v361_v6, %v360_v4  ;;  %v350_v8 = vld [vmem:[%s290_s30] sm:$0xff]  ;;  %vm843_vm2 = vmpackc.low %vm362_vm1, %vm362_vm1  ;;  %v437_v16 = vshrl.u32 %v436_v15, 7  ;;  %s1163_s7 = smov 2   ;;  %s1164_s20 = smov 4   ;;  %vm531_vm6 = vcmask 130048   ;;  %v356_v37 = vld [vmem:[%s1448_s18] sm:$0xff] }
  0x9b   : > { %837 = vmatpush3.bf16.msra.mxu0 %v836_v5  ;;  %v351_v9 = vmul.f32 0.17677669, %v350_v8  ;;  %v354_v11 = vld [vmem:[%s299_s12 + $0x8] sm:$0xff]  ;;  %v529_v28 = vld [vmem:[%s1529_s4] sm:$0xff]  ;;  %s794_s14 = sshll.u32 %s1143_s21, 7  ;;  %s348_s25 = scalar_lea.vmem [#allocation10], %s783_s26 }
  0x9c   : > { %838 = vmatprep.subr.bf16.mxu0 %v1159_v0  ;;  %v842_v12 = vpack.c.bf16 %v354_v11, %v353_v10  ;;  %v438_v17 = vand.u32 1, %v437_v16  ;;  %v443_v22 = vand.u32 2, %v437_v16  ;;  %v448_v25 = vand.u32 4, %v437_v16  ;;  %v357_v38 = vld [vmem:[%s1448_s18 + $0x8] sm:$0xff]  ;;  %s632_s1 = sshll.u32 %s348_s25, 4  ;;  %s1475_s24 = scalar_lea.hbm %s1530_s5, %s794_s14  ;;  %s1477_s1 = int_to_ptr.vmem [resolvable:$true] %s632_s1 }
  0x9d   : > { %v846_v39 = vpack.c.bf16 %v357_v38, %v356_v37  ;;  %s618_s29 = scalar_lea.sflag [#allocation4], %s1432_s15  ;;  %s1061_s10 = scalar_lea.vmem %s1477_s1, 128 }
  0x9e   : > { %844 = vmatpush3.bf16.xpose.msk.msra.mxu1 %vm843_vm2, %v842_v12  ;;  %vm439_vm3 = vcmp.ne.s32.totalorder %v438_v17, 0  ;;  %vm444_vm4 = vcmp.ne.s32.totalorder %v443_v22, 0  ;;  %vm449_vm5 = vcmp.ne.s32.totalorder %v448_v25, 0  ;;  %p1062_p5 = scmp.ne.s32.totalorder %s1477_s1, %s1061_s10  ;;  %p1576_p10 = scmp.ne.s32.totalorder %s1563_s6, 0 }
  0x9f   : > { %840 = vmatpush3.bf16.msra.mxu0 %v839_v7  ;;  %s1165_s21 = smov [#allocation10]  }
  0xa0   : > { %845 = vmatprep.subr.bf16.mxu0 %v1159_v0  ;;  %p1063_p13 = pnand %p1062_p5, %p1576_p10  ;;  %s1065_s27 = sshll.u32 %s1165_s21, 4  ;;  %s1066_s27 = int_to_ptr.vmem [resolvable:$false] %s1065_s27 }
  0xa1   : > { %s1067_s26 = scalar_lea.vmem %s1066_s27, 256  ;;  %p1068_p4 = scmp.lt.s32.totalorder %s1477_s1, %s1066_s27 }
  0xa2   : > { %819 = vmatmul.mubr.msk.f32.vlgmr.msra.gmra.mrb[0].mxu0 %vm362_vm1, %v351_v9  ;;  %p1064_p7 = pneg %p1063_p13  ;;  %p1069_p6 = scmp.lt.s32.totalorder %s1067_s26, %s1061_s10 }
  0xa3   : > { %832 = vmatprep.mubr.msk.f32.mxu0 %vm1160_vm0, %v1161_v1  ;;  %847 = vmatpush3.bf16.msra.mxu0 %v846_v39 }
  0xa4   : > { %p1070_p8 = por %p1069_p6, %p1068_p4 }
  0xa5   : > { %826 = vmatmul.mubr.msk.f32.vlgmr.msra.gmra.mrb[0].mxu1 %vm362_vm1, %v351_v9 }
  0xa6   : > { %p1071_p12 = pnand %p1070_p8, %p1064_p7 }
 0x175   : > { %v432_v13 = vpop.f32.mrb[0].mxu0 }
 0x176   : > { %440 = vrot.lane.b32.xlu0 %v432_v13, %s1162_s11  ;;  %v820_v14 = vpop.f32.mrb[1].mxu0 }
 0x178   : > { %v525_v20 = vpop.f32.mrb[0].mxu1 }
 0x179   : > { %v827_v21 = vpop.f32.mrb[1].mxu1 }
 0x1e8   : > { %v441_v18 = vpop.permute.xlu0 %440 }
 0x1e9   : > { %v442_v19 = vsel %vm439_vm3, %v441_v18, %v432_v13 }
 0x1ea   : > { %445 = vrot.lane.b32.xlu0 %v442_v19, %s1163_s7 }
 0x25c   : > { %v446_v23 = vpop.permute.xlu0 %445 }
 0x25d   : > { %v447_v24 = vsel %vm444_vm4, %v446_v23, %v442_v19 }
 0x25e   : > { %450 = vrot.lane.b32.xlu1 %v447_v24, %s1164_s20 }
 0x2d0   : > { %v451_v26 = vpop.permute.xlu1 %450 }
 0x2d1   : > { %v452_v27 = vsel %vm449_vm5, %v451_v26, %v447_v24 }
 0x2d2   : > { %v526_v29 = vadd.f32 %v525_v20, %v452_v27 }
 0x2d4   : > { %v530_v30 = vadd.f32 %v529_v28, %v526_v29 }
 0x2d6   : > { %v532_v31 = vsel %vm531_vm6, %v530_v30, -inf }
 0x2d7   : > { %533 = vmax.xlane.f32.xlu1 %v532_v31 }
 0x364   : > { %v534_v32 = vpop.xlane.xlu1 %533 }
 0x365   : > { %v535_v33 = vsub.f32 %v530_v30, %v534_v32 }
 0x367   : > { %v536_v34 = vmul.f32 1.442695, %v535_v33 }
 0x369   : > { %939 = vpow2.f32 %v536_v34 }
 0x373   : > { %v940_v35 = vpop.eup %939 }
 0x374   : > { %v538_v36 = vsel %vm531_vm6, %v940_v35, 0.0 }
 0x375   : > { %539 = vadd.xlane.f32.xlu0 %v538_v36 }
 0x402   : > { %v540_v40 = vpop.xlane.xlu0 %539 }
 0x403   : > { %941 = vrcp.f32 %v540_v40 }
 0x40d   : > { %v942_v41 = vpop.eup %941 }
 0x40e   : > { %v542_v42 = vmul.f32 %v942_v41, %v940_v35 }
 0x410   : > { %833 = vmatmul.mubr.msk.f32.vlgmr.msra.gmra.mrb[2].mxu0 %vm531_vm6, %v542_v42 }
 0x4e3   : > { %v612_v43 = vpop.f32.mrb[2].mxu0 }
 0x4e4   : > { %616 = vst.msk [vmem:[%s348_s25] sm:$0xff] %vm362_vm1, %v612_v43  ;;  %v834_v44 = vpop.f32.mrb[3].mxu0 }
 0x4e5   : > { %1074 = shalt.err (!%p1071_p12)
}
 0x4e6   : > { %s1075_s15 = scalar_lea.hbm %s1475_s24, 128  ;;  %s1079_s13 = scalar_lea.hbm %s1530_s5, 256 }
 0x4e7   : > { %p1076_p0 = scmp.ne.s32.totalorder %s1475_s24, %s1075_s15  ;;  %p1080_p11 = scmp.lt.u32.totalorder %s1475_s24, %s1530_s5 }
 0x4e8   : > { %p1081_p3 = scmp.lt.u32.totalorder %s1079_s13, %s1075_s15  ;;  %p1083_p5 = scmp.lt.u32.totalorder %s1075_s15, %s1475_s24 }
 0x4e9   : > { %p1077_p2 = pnand %p1076_p0, %p1576_p10 }
 0x4ea   : > { %p1082_p1 = por %p1081_p3, %p1080_p11 }
 0x4eb   : > { %p1078_p9 = pneg %p1077_p2 }
 0x4ec   : > { %p1084_p13 = por %p1083_p5, %p1082_p1 }
 0x4ee   : > { %p1085_p7 = pnand %p1084_p13, %p1078_p9 }
 0x4f0   : > { %1088 = shalt.err (!%p1085_p7)
}
 0x4f1   : > { %858 = dma.vmem_to_hbm [thread:$0]  (%p1576_p10), %s1477_s1, 128, %s1475_s24, %s618_s29  }
 0x4f2 PF: > { %s1577_s12 = sld [smem:[#allocation15_spill]]  ;;  %s1578_s18 = sld [smem:[#allocation21_spill]] }
 0x4f3   : > { %s1579_s11 = sld [smem:[#allocation18_spill]] }
 0x4f8   : > { %s644_s7 = sand.u32 1, %s1577_s12   ;;  %p1580_p4 = scmp.ne.s32.totalorder %s1578_s18, 0 }
 0x4f9   : > { %p1581_p6 = scmp.ge.s32.totalorder %s1579_s11, 2  ;;  %s645_s20 = scalar_lea.sflag [#allocation4], %s644_s7 }
 0x4fb   : > { %p875_p8 = pnand %p1581_p6, %p1580_p4 }
 0x4fd   : > { %1126 = dma.done.wait (!%p875_p8), %s645_s20, 128  }
 0x4fe   : > { %1128 = vsyncadd (!%p875_p8), %s645_s20, 4294967168  ;;  %s25_s23 = sadd.s32 1, %s1579_s11   ;;  %s1582_s16 = sld [smem:[#allocation16_spill]] }
 0x4ff   : > { %p22_p12 = scmp.ge.s32.totalorder %s25_s23, 4   ;;  %s1583_s20 = sld [smem:[#allocation20_spill]] }
 0x500   : > { %s1584_s21 = sld [smem:[#allocation17_spill]]  ;;  %s1585_s22 = sld [smem:[#allocation19_spill]] }
 0x501   : > { %s1586_s18 = smov %s1135_s19  ;;  %24 = sbr.rel (!%p22_p12) target bundleno = 11 (0xb), region = 115 }
 0x504   : > { %s1587_s19 = smov %s1582_s16 }
 0x508   :  { %650 = vsyncpa [#allocation3], 1 }
 0x509   :  { %652 = vsyncpa [#allocation3 + $0x1], 1 }
 0x50a   :  { %653 = vsyncpa [#allocation6], 1 }
 0x50b   :  { %655 = vsyncpa [#allocation6 + $0x1], 1 }
 0x50c   :  { %656 = vsyncpa [#allocation9], 1 }
 0x50d   :  { %657 = vsyncpa [#allocation4], 1 }
 0x50e   :  { %659 = vsyncpa [#allocation4 + $0x1], 1 }

</bundles_post_ra>
